<compile_context>
chip_gen: v7x
topology: tpu7x:2x2x1
jax: 0.10.0
libtpu: 0.0.40
codegen_flags: <defaults>
</compile_context>

<pallas_src>
import functools

import jax
import jax.numpy as jnp
from jax import lax
from jax.experimental import pallas as pl
from jax.experimental.pallas import tpu as pltpu


def _round_up(x, m):
    return ((x + m - 1) // m) * m


def _policy_kernel(state_ref, w1_ref, wslab_ref, ball_ref, out_ref,
                   *, hidden, action_size):
    """One batch tile: 4 MXU matmuls, ReLU/ELU on the VPU, one lane-dense store."""
    H = hidden

    def mm(x, w):
        # Cast activations to the weight dtype at the MXU input only;
        # accumulate and do all element-wise math in f32.
        return jnp.dot(x.astype(w.dtype), w, preferred_element_type=jnp.float32)

    x = state_ref[...].astype(jnp.float32)

    # Static lane-aligned carves of the fused resident slabs (zero-cost views;
    # H is 128 so every offset is a multiple of 128 lanes).
    w2 = wslab_ref[:, 0:H]
    wa1 = wslab_ref[:, H:2 * H]
    wh = wslab_ref[:, 2 * H:]                 # (H, 128) = [Wa2 | Wa3 | 0-pad]
    b1 = ball_ref[:, 0:H]
    b2 = ball_ref[:, H:2 * H]
    ba1 = ball_ref[:, 2 * H:3 * H]
    bh = ball_ref[:, 3 * H:]                  # (1, 128) = [ba2 | ba3 | 0-pad]

    h = jnp.maximum(mm(x, w1_ref[...]) + b1, 0.0)   # fc1 + relu
    h = jnp.maximum(mm(h, w2) + b2, 0.0)            # fc2 + relu
    a = jnp.maximum(mm(h, wa1) + ba1, 0.0)          # fc_A1 + relu
    head = mm(a, wh) + bh                           # fused fc_A2 | fc_A3 heads

    # elu(.)+1 only on the real sigma columns; mu and the zero-padding columns
    # stay linear (padding is discarded by the wrapper anyway).
    cols = lax.broadcasted_iota(jnp.int32, head.shape, 1)
    is_sigma = (cols >= action_size) & (cols < 2 * action_size)
    elu_p1 = jnp.where(head > 0.0,
                       head,
                       jnp.exp(jnp.minimum(head, 0.0)) - 1.0) + 1.0
    out_ref[...] = jnp.where(is_sigma, elu_p1, head).astype(out_ref.dtype)


def prepare_params(params, compute_dtype=jnp.bfloat16):
    """One-time conversion from PyTorch layout (out,in)/(out,) to kernel layout.

    Weights -> [in, out] in compute_dtype (bf16 default: faster MXU on all TPU
    generations, f32 accumulation is kept in-kernel).  The two action heads are
    fused and zero-padded to a 128-wide lane-dense slab.  All hidden-sized
    weights are concatenated into one slab and all biases into one row so the
    kernel has only 3 resident inputs.  Call ONCE, outside the rollout loop.
    Returns (prep_arrays_dict, action_size).  Assumes hidden is a multiple of
    128 (it is 128 in this module).
    """
    f32 = jnp.float32
    w1 = jnp.asarray(params["fc1_w"], f32).T          # (S, H)
    w2 = jnp.asarray(params["fc2_w"], f32).T          # (H, H)
    wa1 = jnp.asarray(params["fc_A1_w"], f32).T       # (H, H)
    wa2 = jnp.asarray(params["fc_A2_w"], f32).T       # (H, A)
    wa3 = jnp.asarray(params["fc_A3_w"], f32).T       # (H, A)
    b1 = jnp.asarray(params["fc1_b"], f32)
    b2 = jnp.asarray(params["fc2_b"], f32)
    ba1 = jnp.asarray(params["fc_A1_b"], f32)
    ba2 = jnp.asarray(params["fc_A2_b"], f32)
    ba3 = jnp.asarray(params["fc_A3_b"], f32)

    H = w2.shape[0]
    A = wa2.shape[1]
    head_pad = max(128, _round_up(2 * A, 128))        # lane-dense head width

    wh = jnp.zeros((H, head_pad), f32)
    wh = wh.at[:, :A].set(wa2).at[:, A:2 * A].set(wa3)
    bh = jnp.zeros((head_pad,), f32)
    bh = bh.at[:A].set(ba2).at[A:2 * A].set(ba3)

    prep = {
        "w1": w1.astype(compute_dtype),                                  # (S, H)
        "wslab": jnp.concatenate([w2, wa1, wh], axis=1).astype(compute_dtype),
        "ball": jnp.concatenate([b1, b2, ba1, bh], axis=0)[None, :],     # f32
    }
    return prep, A


@functools.partial(jax.jit,
                   static_argnames=("action_size", "block_b", "core_parallel"))
def policy_forward(state, prep, action_size, block_b=1024, core_parallel=False):
    """state: [B, state_size] f32.  prep: arrays dict from prepare_params()."""
    state = jnp.asarray(state, jnp.float32)
    B, S = state.shape
    H = prep["w1"].shape[1]
    head_pad = prep["ball"].shape[1] - 3 * H

    # Batch tile: multiple of 8 rows, >= 2 grid steps for large batches (so
    # both v7x TensorCores get work), capped at block_b (VMEM-safe everywhere).
    if B % 8 == 0 and B > 8:
        TB = min(block_b, max(8, _round_up(pl.cdiv(B, 2), 8)))
    else:
        TB = B  # tiny / ragged batch: one full-extent tile
    grid = (pl.cdiv(B, TB),)

    sem = (pltpu.CORE_PARALLEL,) if core_parallel else ("parallel",)

    out = pl.pallas_call(
        functools.partial(_policy_kernel, hidden=H, action_size=action_size),
        out_shape=jax.ShapeDtypeStruct((B, head_pad), jnp.float32),
        grid=grid,
        in_specs=[
            pl.BlockSpec((TB, S), lambda i: (i, 0)),            # batch-tiled
            pl.BlockSpec(prep["w1"].shape, lambda i: (0, 0)),    # resident
            pl.BlockSpec(prep["wslab"].shape, lambda i: (0, 0)),  # resident
            pl.BlockSpec(prep["ball"].shape, lambda i: (0, 0)),   # resident
        ],
        out_specs=pl.BlockSpec((TB, head_pad), lambda i: (i, 0)),  # lane-dense
        compiler_params=pltpu.CompilerParams(dimension_semantics=sem),
    )(state, prep["w1"], prep["wslab"], prep["ball"])

    mu = out[:, :action_size]
    sigma = out[:, action_size:2 * action_size]
    # TODO(synk): torch.distributions.Normal object itself has no Pallas
    # equivalent; we return its (loc, scale) parameters.
    return mu, sigma


def init_params(key, state_size, action_size, hidden=128):
    """Deterministic init mimicking nn.Linear default (uniform +-1/sqrt(fan_in))."""
    def linear(k, fan_in, fan_out):
        kw, kb = jax.random.split(k)
        bound = 1.0 / jnp.sqrt(fan_in)
        w = jax.random.uniform(kw, (fan_out, fan_in), jnp.float32, -bound, bound)
        b = jax.random.uniform(kb, (fan_out,), jnp.float32, -bound, bound)
        return w, b

    keys = jax.random.split(key, 5)
    p = {}
    p["fc1_w"], p["fc1_b"] = linear(keys[0], state_size, hidden)
    p["fc2_w"], p["fc2_b"] = linear(keys[1], hidden, hidden)
    p["fc_A1_w"], p["fc_A1_b"] = linear(keys[2], hidden, hidden)
    p["fc_A2_w"], p["fc_A2_b"] = linear(keys[3], hidden, action_size)
    p["fc_A3_w"], p["fc_A3_b"] = linear(keys[4], hidden, action_size)
    return p


def _reference(state, params):
    """Pure-JAX reference for correctness check (PyTorch-layout params)."""
    def lin(x, w, b):
        return x @ w.T + b
    x = jax.nn.relu(lin(state, params["fc1_w"], params["fc1_b"]))
    x = jax.nn.relu(lin(x, params["fc2_w"], params["fc2_b"]))
    a = jax.nn.relu(lin(x, params["fc_A1_w"], params["fc_A1_b"]))
    mu = lin(a, params["fc_A2_w"], params["fc_A2_b"])
    z = lin(a, params["fc_A3_w"], params["fc_A3_b"])
    sigma = jnp.where(z > 0, z, jnp.exp(z) - 1.0) + 1.0
    return mu, sigma


if __name__ == "__main__":
    key = jax.random.PRNGKey(0)
    k_param, k_state, k_big = jax.random.split(key, 3)

    batch = 8
    state_size = 32
    action_size = 4

    params = init_params(k_param, state_size, action_size)
    state = jax.random.normal(k_state, (batch, state_size), jnp.float32)
    mu_ref, sigma_ref = _reference(state, params)

    # f32 weight path: tight tolerance.
    prep32, A = prepare_params(params, compute_dtype=jnp.float32)
    mu, sigma = policy_forward(state, prep32, A)
    jax.block_until_ready((mu, sigma))
    assert jnp.allclose(mu, mu_ref, atol=1e-4, rtol=1e-4)
    assert jnp.allclose(sigma, sigma_ref, atol=1e-4, rtol=1e-4)
    assert bool(jnp.all(sigma > 0))  # valid Normal scale

    # bf16 weight path (default; recommended on v5e/v6e/v7x): looser tolerance.
    prep16, _ = prepare_params(params)
    mu16, sigma16 = policy_forward(state, prep16, A)
    jax.block_until_ready((mu16, sigma16))
    assert jnp.allclose(mu16, mu_ref, atol=5e-2, rtol=5e-2)
    assert jnp.allclose(sigma16, sigma_ref, atol=5e-2, rtol=5e-2)
    assert bool(jnp.all(sigma16 > 0))

    # Multi-tile path (B > TB -> 2 grid steps) with bf16 weights.
    big_state = jax.random.normal(k_big, (2048, state_size), jnp.float32)
    mu_b, sigma_b = policy_forward(big_state, prep16, A)
    jax.block_until_ready((mu_b, sigma_b))
    mu_br, sigma_br = _reference(big_state, params)
    assert jnp.allclose(mu_b, mu_br, atol=5e-2, rtol=5e-2)
    assert jnp.allclose(sigma_b, sigma_br, atol=5e-2, rtol=5e-2)

    print("KERNEL_OK")
</pallas_src>

<mosaic_0001>
module attributes {stable_mosaic.version = 11 : i64} {
  func.func @_policy_kernel(%arg0: i32, %arg1: memref<8x32xf32, #tpu.memory_space<vmem>>, %arg2: memref<32x128xf32, #tpu.memory_space<vmem>>, %arg3: memref<128x384xf32, #tpu.memory_space<vmem>>, %arg4: memref<1x512xf32, #tpu.memory_space<vmem>>, %arg5: memref<8x128xf32, #tpu.memory_space<vmem>>) attributes {dimension_semantics = [#tpu.dimension_semantics<parallel>], iteration_bounds = array<i64: 1>, scalar_prefetch = 0 : i64, scratch_operands = 0 : i64, tpu.core_type = #tpu.core_type<tc>, window_params = [{transform_indices = @transform_0, window_bounds = array<i64: 8, 32>}, {pipeline_mode = #tpu.pipeline_mode<synchronous>, transform_indices = @transform_1, window_bounds = array<i64: 32, 128>}, {pipeline_mode = #tpu.pipeline_mode<synchronous>, transform_indices = @transform_2, window_bounds = array<i64: 128, 384>}, {pipeline_mode = #tpu.pipeline_mode<synchronous>, transform_indices = @transform_3, window_bounds = array<i64: 1, 512>}, {transform_indices = @transform_4, window_bounds = array<i64: 8, 128>}]} {
    %c0 = arith.constant 0 : index
    %c0_0 = arith.constant 0 : index
    %0 = vector.load %arg1[%c0, %c0_0] : memref<8x32xf32, #tpu.memory_space<vmem>>, vector<8x32xf32>
    %c0_1 = arith.constant 0 : index
    %c0_2 = arith.constant 0 : index
    %1 = vector.load %arg3[%c0_1, %c0_2] : memref<128x384xf32, #tpu.memory_space<vmem>>, vector<128x128xf32>
    %c0_3 = arith.constant 0 : index
    %c128 = arith.constant 128 : index
    %2 = vector.load %arg3[%c0_3, %c128] : memref<128x384xf32, #tpu.memory_space<vmem>>, vector<128x128xf32>
    %c0_4 = arith.constant 0 : index
    %c256 = arith.constant 256 : index
    %3 = vector.load %arg3[%c0_4, %c256] : memref<128x384xf32, #tpu.memory_space<vmem>>, vector<128x128xf32>
    %c0_5 = arith.constant 0 : index
    %c0_6 = arith.constant 0 : index
    %4 = vector.load %arg4[%c0_5, %c0_6] : memref<1x512xf32, #tpu.memory_space<vmem>>, vector<1x128xf32>
    %c0_7 = arith.constant 0 : index
    %c128_8 = arith.constant 128 : index
    %5 = vector.load %arg4[%c0_7, %c128_8] : memref<1x512xf32, #tpu.memory_space<vmem>>, vector<1x128xf32>
    %c0_9 = arith.constant 0 : index
    %c256_10 = arith.constant 256 : index
    %6 = vector.load %arg4[%c0_9, %c256_10] : memref<1x512xf32, #tpu.memory_space<vmem>>, vector<1x128xf32>
    %c0_11 = arith.constant 0 : index
    %c384 = arith.constant 384 : index
    %7 = vector.load %arg4[%c0_11, %c384] : memref<1x512xf32, #tpu.memory_space<vmem>>, vector<1x128xf32>
    %c0_12 = arith.constant 0 : index
    %c0_13 = arith.constant 0 : index
    %8 = vector.load %arg2[%c0_12, %c0_13] : memref<32x128xf32, #tpu.memory_space<vmem>>, vector<32x128xf32>
    %cst = arith.constant dense<0.000000e+00> : vector<8x128xf32>
    %9 = tpu.matmul %0, %8, %cst {dimension_numbers = #tpu.dot_dimension_numbers<[1], [0], [0], [1], [0, 0, 1, 1], [], []>} : vector<8x32xf32>, vector<32x128xf32>, vector<8x128xf32> -> vector<8x128xf32>
    %10 = vector.broadcast %4 : vector<1x128xf32> to vector<8x128xf32>
    %11 = arith.addf %9, %10 : vector<8x128xf32>
    %cst_14 = arith.constant 0.000000e+00 : f32
    %12 = vector.broadcast %cst_14 : f32 to vector<8x128xf32>
    %13 = arith.maximumf %11, %12 : vector<8x128xf32>
    %cst_15 = arith.constant dense<0.000000e+00> : vector<8x128xf32>
    %14 = tpu.matmul %13, %1, %cst_15 {dimension_numbers = #tpu.dot_dimension_numbers<[1], [0], [0], [1], [0, 0, 1, 1], [], []>} : vector<8x128xf32>, vector<128x128xf32>, vector<8x128xf32> -> vector<8x128xf32>
    %15 = vector.broadcast %5 : vector<1x128xf32> to vector<8x128xf32>
    %16 = arith.addf %14, %15 : vector<8x128xf32>
    %cst_16 = arith.constant 0.000000e+00 : f32
    %17 = vector.broadcast %cst_16 : f32 to vector<8x128xf32>
    %18 = arith.maximumf %16, %17 : vector<8x128xf32>
    %cst_17 = arith.constant dense<0.000000e+00> : vector<8x128xf32>
    %19 = tpu.matmul %18, %2, %cst_17 {dimension_numbers = #tpu.dot_dimension_numbers<[1], [0], [0], [1], [0, 0, 1, 1], [], []>} : vector<8x128xf32>, vector<128x128xf32>, vector<8x128xf32> -> vector<8x128xf32>
    %20 = vector.broadcast %6 : vector<1x128xf32> to vector<8x128xf32>
    %21 = arith.addf %19, %20 : vector<8x128xf32>
    %cst_18 = arith.constant 0.000000e+00 : f32
    %22 = vector.broadcast %cst_18 : f32 to vector<8x128xf32>
    %23 = arith.maximumf %21, %22 : vector<8x128xf32>
    %cst_19 = arith.constant dense<0.000000e+00> : vector<8x128xf32>
    %24 = tpu.matmul %23, %3, %cst_19 {dimension_numbers = #tpu.dot_dimension_numbers<[1], [0], [0], [1], [0, 0, 1, 1], [], []>} : vector<8x128xf32>, vector<128x128xf32>, vector<8x128xf32> -> vector<8x128xf32>
    %25 = vector.broadcast %7 : vector<1x128xf32> to vector<8x128xf32>
    %26 = arith.addf %24, %25 : vector<8x128xf32>
    %27 = tpu.iota {dimensions = array<i32: 1>} : vector<8x128xi32>
    %c4_i32 = arith.constant 4 : i32
    %28 = vector.broadcast %c4_i32 : i32 to vector<8x128xi32>
    %29 = arith.cmpi sge, %27, %28 : vector<8x128xi32>
    %c8_i32 = arith.constant 8 : i32
    %30 = vector.broadcast %c8_i32 : i32 to vector<8x128xi32>
    %31 = arith.cmpi slt, %27, %30 : vector<8x128xi32>
    %32 = arith.andi %29, %31 : vector<8x128xi1>
    %cst_20 = arith.constant 0.000000e+00 : f32
    %33 = vector.broadcast %cst_20 : f32 to vector<8x128xf32>
    %34 = arith.cmpf ogt, %26, %33 : vector<8x128xf32>
    %cst_21 = arith.constant 0.000000e+00 : f32
    %35 = vector.broadcast %cst_21 : f32 to vector<8x128xf32>
    %36 = arith.minimumf %26, %35 : vector<8x128xf32>
    %37 = math.exp %36 : vector<8x128xf32>
    %cst_22 = arith.constant 1.000000e+00 : f32
    %38 = vector.broadcast %cst_22 : f32 to vector<8x128xf32>
    %39 = arith.subf %37, %38 : vector<8x128xf32>
    %40 = arith.select %34, %26, %39 : vector<8x128xi1>, vector<8x128xf32>
    %cst_23 = arith.constant 1.000000e+00 : f32
    %41 = vector.broadcast %cst_23 : f32 to vector<8x128xf32>
    %42 = arith.addf %40, %41 : vector<8x128xf32>
    %43 = arith.select %32, %42, %26 : vector<8x128xi1>, vector<8x128xf32>
    %c0_24 = arith.constant 0 : index
    %c0_25 = arith.constant 0 : index
    %44 = vector.load %arg5[%c0_24, %c0_25] : memref<8x128xf32, #tpu.memory_space<vmem>>, vector<8x128xf32>
    tpu.vector_store %arg5[%c0_24, %c0_25], %43 {strides = array<i32>} : memref<8x128xf32, #tpu.memory_space<vmem>>, vector<8x128xf32>,
    return
  }
  func.func @transform_0(%arg0: i32) -> (i32, i32) {
    %c0_i32 = arith.constant 0 : i32
    %c0_i32_0 = arith.constant 0 : i32
    return %arg0, %c0_i32 : i32, i32
  }
  func.func @transform_1(%arg0: i32) -> (i32, i32) {
    %c0_i32 = arith.constant 0 : i32
    %c0_i32_0 = arith.constant 0 : i32
    %c0_i32_1 = arith.constant 0 : i32
    return %c0_i32, %c0_i32_0 : i32, i32
  }
  func.func @transform_2(%arg0: i32) -> (i32, i32) {
    %c0_i32 = arith.constant 0 : i32
    %c0_i32_0 = arith.constant 0 : i32
    %c0_i32_1 = arith.constant 0 : i32
    return %c0_i32, %c0_i32_0 : i32, i32
  }
  func.func @transform_3(%arg0: i32) -> (i32, i32) {
    %c0_i32 = arith.constant 0 : i32
    %c0_i32_0 = arith.constant 0 : i32
    %c0_i32_1 = arith.constant 0 : i32
    return %c0_i32, %c0_i32_0 : i32, i32
  }
  func.func @transform_4(%arg0: i32) -> (i32, i32) {
    %c0_i32 = arith.constant 0 : i32
    %c0_i32_0 = arith.constant 0 : i32
    return %arg0, %c0_i32 : i32, i32
  }
}

</mosaic_0001>

<bundles_post_ra>
// kernel: policy_forward.1
= control target key start
LH: loop header
LB: loop body
LE: loop exit
PB: predicated region body
PF: predicated region fallthrough
CT: control target
= control target key end

     0   :  { %9 = vsyncpa [#allocation3], 0  ;;  %s941_s0 = inlined_call_operand.hbm [shape: f32[8,32], index: 0, kind: input, shape index: {}]   ;;  %s942_s1 = inlined_call_operand.hbm [shape: f32[32,128], index: 1, kind: input, shape index: {}]   ;;  %s943_s2 = inlined_call_operand.hbm [shape: f32[128,384], index: 2, kind: input, shape index: {}]   ;;  %s944_s3 = inlined_call_operand.hbm [shape: f32[1,512], index: 3, kind: input, shape index: {}]   ;;  %s945_s4 = inlined_call_operand.vmem [shape: f32[8,128], index: 4, kind: output, shape index: {}]  }
   0x1   :  { %10 = vsyncpa [#allocation5], 0 }
   0x2   :  { %11 = vsyncpa [#allocation8], 0  ;;  %s820_s15 = smov [#allocation4]   ;;  %s726_s19 = scalar_lea.hbm %s942_s1, 512 }
   0x3   :  { %s27_s16 = sshll.u32 %s820_s15, 4  ;;  %p727_p0 = scmp.ne.s32.totalorder %s942_s1, %s726_s19  ;;  %s28_s16 = int_to_ptr.vmem [resolvable:$true] %s27_s16 }
   0x4   :  { %p730_p1 = scmp.lt.u32.totalorder %s726_s19, %s942_s1 }
   0x6   :  { %p732_p2 = pnand %p730_p1, %p727_p0 }
   0x8   :  { %735 = shalt.err (!%p732_p2)
}
   0x9   :  { %s736_s24 = scalar_lea.vmem %s28_s16, 512  ;;  %p741_p4 = scmp.lt.s32.totalorder %s28_s16, %s28_s16 }
   0xa   :  { %p737_p3 = scmp.ne.s32.totalorder %s28_s16, %s736_s24  ;;  %p742_p5 = scmp.lt.s32.totalorder %s736_s24, %s736_s24 }
   0xc   :  { %p743_p6 = por %p742_p5, %p741_p4 }
   0xe   :  { %p744_p7 = pnand %p743_p6, %p737_p3 }
  0x10   :  { %747 = shalt.err (!%p744_p7)
}
  0x11   :  { %s821_s25 = smov 128   ;;  %s822_s26 = smov 8  }
  0x12   :  { %33 = dma.hbm_to_vmem [thread:$0]  %s942_s1, 512, %s28_s16, [#allocation5], %s821_s25, %s821_s25, %s822_s26  }
  0x13   :  { %s823_s29 = smov [#allocation2]   ;;  %s824_s5 = smov [#allocation6]  }
  0x14   :  { %s18_s30 = sshll.u32 %s823_s29, 4  ;;  %s39_s6 = sshll.u32 %s824_s5, 4  ;;  %s19_s30 = int_to_ptr.vmem [resolvable:$true] %s18_s30  ;;  %s40_s6 = int_to_ptr.vmem [resolvable:$true] %s39_s6 }
  0x15   :  { %s748_s9 = scalar_lea.hbm %s941_s0, 128 }
  0x16   :  { %p749_p8 = scmp.ne.s32.totalorder %s941_s0, %s748_s9  ;;  %p752_p9 = scmp.lt.u32.totalorder %s748_s9, %s941_s0 }
  0x18   :  { %p754_p10 = pnand %p752_p9, %p749_p8 }
  0x1a   :  { %757 = shalt.err (!%p754_p10)
}
  0x1b   :  { %s758_s1 = scalar_lea.vmem %s19_s30, 128  ;;  %p763_p12 = scmp.lt.s32.totalorder %s19_s30, %s19_s30 }
  0x1c   :  { %p759_p11 = scmp.ne.s32.totalorder %s19_s30, %s758_s1  ;;  %p764_p13 = scmp.lt.s32.totalorder %s758_s1, %s758_s1 }
  0x1e   :  { %p765_p0 = por %p764_p13, %p763_p12 }
  0x20   :  { %p766_p1 = pnand %p765_p0, %p759_p11 }
  0x22   :  { %769 = shalt.err (!%p766_p1)
}
  0x23   :  { %21 = dma.hbm_to_vmem [thread:$0]  %s941_s0, 128, %s19_s30, [#allocation3]  }
  0x24   :  { %s770_s18 = scalar_lea.hbm %s943_s2, 6144 }
  0x25   :  { %p771_p2 = scmp.ne.s32.totalorder %s943_s2, %s770_s18  ;;  %p774_p3 = scmp.lt.u32.totalorder %s770_s18, %s943_s2 }
  0x27   :  { %p776_p4 = pnand %p774_p3, %p771_p2 }
  0x29   :  { %779 = shalt.err (!%p776_p4)
}
  0x2a   :  { %s780_s23 = scalar_lea.vmem %s40_s6, 6144  ;;  %p785_p6 = scmp.lt.s32.totalorder %s40_s6, %s40_s6 }
  0x2b   :  { %p781_p5 = scmp.ne.s32.totalorder %s40_s6, %s780_s23  ;;  %p786_p7 = scmp.lt.s32.totalorder %s780_s23, %s780_s23 }
  0x2d   :  { %p787_p8 = por %p786_p7, %p785_p6 }
  0x2f   :  { %p788_p9 = pnand %p787_p8, %p781_p5 }
  0x31   :  { %791 = shalt.err (!%p788_p9)
}
  0x32   :  { %s825_s0 = smov 384   ;;  %s826_s24 = smov 24  }
  0x33   :  { %45 = dma.hbm_to_vmem [thread:$0]  %s943_s2, 6144, %s40_s6, [#allocation5], %s825_s0, %s825_s0, %s826_s24  }
  0x34   :  { %s827_s27 = smov [#allocation7]   ;;  %s792_s5 = scalar_lea.hbm %s944_s3, 64 }
  0x35   :  { %s52_s28 = sshll.u32 %s827_s27, 4  ;;  %p793_p10 = scmp.ne.s32.totalorder %s944_s3, %s792_s5  ;;  %s53_s28 = int_to_ptr.vmem [resolvable:$true] %s52_s28 }
  0x36   :  { %p796_p11 = scmp.lt.u32.totalorder %s792_s5, %s944_s3 }
  0x38   :  { %p798_p12 = pnand %p796_p11, %p793_p10 }
  0x3a   :  { %801 = shalt.err (!%p798_p12)
}
  0x3b   :  { %s802_s11 = scalar_lea.vmem %s53_s28, 64  ;;  %p807_p0 = scmp.lt.s32.totalorder %s53_s28, %s53_s28 }
  0x3c   :  { %p803_p13 = scmp.ne.s32.totalorder %s53_s28, %s802_s11  ;;  %p808_p1 = scmp.lt.s32.totalorder %s802_s11, %s802_s11 }
  0x3e   :  { %p809_p2 = por %p808_p1, %p807_p0 }
  0x40   :  { %p810_p3 = pnand %p809_p2, %p803_p13 }
  0x42   :  { %813 = shalt.err (!%p810_p3)
}
  0x43   :  { %55 = dma.hbm_to_vmem [thread:$0]  %s944_s3, 64, %s53_s28, [#allocation8]  }
  0x44   :  { %814 = dma.done.wait [#allocation3], 128  }
  0x45   :  { %815 = vsyncadd [#allocation3], 4294967168 }
  0x46   :  { %816 = dma.done.wait [#allocation5], 6656  }
  0x47   :  { %817 = vsyncadd [#allocation5], 4294960640 }
  0x48   :  { %818 = dma.done.wait [#allocation8], 64  }
  0x49   :  { %819 = vsyncadd [#allocation8], 4294967232  ;;  %v828_v0 = vmov 0.0|0.0   ;;  %vm829_vm0 = vmmov 0   ;;  %v830_v1 = vmov 0.0   ;;  %v121_v2 = vld [vmem:[#allocation4] sm:$0xff] }
  0x4a   :  { %635 = vmatprep.subr.bf16.mxu0 %v828_v0  ;;  %527 = vmatprep.mubr.msk.f32.mxu0 %vm829_vm0, %v830_v1  ;;  %v122_v3 = vld [vmem:[#allocation4 + $0x8] sm:$0xff]  ;;  %v123_v4 = vld [vmem:[#allocation4 + $0x10] sm:$0xff]  ;;  %v124_v6 = vld [vmem:[#allocation4 + $0x18] sm:$0xff]  ;;  %vm131_vm1 = vcmask 261120  }
  0x4b   :  { %641 = vmatprep.subr.bf16.mxu1 %v828_v0  ;;  %562 = vmatprep.mubr.msk.f32.mxu1 %vm829_vm0, %v830_v1  ;;  %v636_v5 = vpack.c.bf16 %v122_v3, %v121_v2  ;;  %v69_v7 = vld [vmem:[#allocation6] sm:$0xff]  ;;  %v70_v8 = vld [vmem:[#allocation6 + $0x18] sm:$0xff]  ;;  %v71_v9 = vld [vmem:[#allocation6 + $0x30] sm:$0xff]  ;;  %v639_v11 = vpack.c.bf16 %v124_v6, %v123_v4 }
  0x4c   :  { %v72_v10 = vld [vmem:[#allocation6 + $0x48] sm:$0xff]  ;;  %v642_v12 = vpack.c.bf16 %v70_v8, %v69_v7  ;;  %v73_v14 = vld [vmem:[#allocation6 + $0x60] sm:$0xff]  ;;  %v74_v15 = vld [vmem:[#allocation6 + $0x78] sm:$0xff] }
  0x4d   :  { %637 = vmatpush3.bf16.msra.mxu0 %v636_v5  ;;  %v645_v13 = vpack.c.bf16 %v72_v10, %v71_v9  ;;  %v68_v16 = vld [vmem:[#allocation2] sm:$0xff]  ;;  %v648_v17 = vpack.c.bf16 %v74_v15, %v73_v14  ;;  %v75_v18 = vld [vmem:[#allocation6 + $0x90] sm:$0xff]  ;;  %v76_v19 = vld [vmem:[#allocation6 + $0xa8] sm:$0xff] }
  0x4e   :  { %638 = vmatprep.subr.bf16.mxu0 %v828_v0  ;;  %643 = vmatpush3.bf16.msra.mxu1 %v642_v12  ;;  %v651_v20 = vpack.c.bf16 %v76_v19, %v75_v18  ;;  %v77_v21 = vld [vmem:[#allocation6 + $0xc0] sm:$0xff]  ;;  %v78_v22 = vld [vmem:[#allocation6 + $0xd8] sm:$0xff]  ;;  %v79_v24 = vld [vmem:[#allocation6 + $0xf0] sm:$0xff] }
  0x4f   :  { %644 = vmatprep.subr.bf16.mxu1 %v828_v0  ;;  %v654_v23 = vpack.c.bf16 %v78_v22, %v77_v21  ;;  %v80_v25 = vld [vmem:[#allocation6 + $0x108] sm:$0xff]  ;;  %v81_v27 = vld [vmem:[#allocation6 + $0x120] sm:$0xff]  ;;  %v82_v28 = vld [vmem:[#allocation6 + $0x138] sm:$0xff] }
  0x50   :  { %v657_v26 = vpack.c.bf16 %v80_v25, %v79_v24  ;;  %v660_v29 = vpack.c.bf16 %v82_v28, %v81_v27  ;;  %v83_v30 = vld [vmem:[#allocation6 + $0x150] sm:$0xff]  ;;  %v84_v31 = vld [vmem:[#allocation6 + $0x168] sm:$0xff]  ;;  %v86_v34 = vld [vmem:[#allocation6 + $0x20] sm:$0xff] }
  0x51   :  { %640 = vmatpush3.bf16.msra.mxu0 %v639_v11  ;;  %v663_v32 = vpack.c.bf16 %v84_v31, %v83_v30  ;;  %v85_v33 = vld [vmem:[#allocation6 + $0x8] sm:$0xff]  ;;  %v87_v35 = vld [vmem:[#allocation6 + $0x38] sm:$0xff]  ;;  %v88_v37 = vld [vmem:[#allocation6 + $0x50] sm:$0xff] }
  0x52   :  { %665 = vmatprep.subr.bf16.mxu0 %v828_v0  ;;  %646 = vmatpush3.bf16.msra.mxu1 %v645_v13  ;;  %v666_v36 = vpack.c.bf16 %v86_v34, %v85_v33  ;;  %v669_v38 = vpack.c.bf16 %v88_v37, %v87_v35  ;;  %v89_v39 = vld [vmem:[#allocation6 + $0x68] sm:$0xff]  ;;  %v90_v40 = vld [vmem:[#allocation6 + $0x80] sm:$0xff]  ;;  %v91_v42 = vld [vmem:[#allocation6 + $0x98] sm:$0xff] }
  0x53   :  { %647 = vmatprep.subr.bf16.mxu1 %v828_v0  ;;  %v672_v41 = vpack.c.bf16 %v90_v40, %v89_v39  ;;  %v92_v43 = vld [vmem:[#allocation6 + $0xb0] sm:$0xff]  ;;  %v93_v45 = vld [vmem:[#allocation6 + $0xc8] sm:$0xff]  ;;  %v94_v46 = vld [vmem:[#allocation6 + $0xe0] sm:$0xff] }
  0x54   :  { %528 = vmatmul.mubr.msk.f32.vlgmr.msra.gmra.mrb[0].mxu0 %vm131_vm1, %v68_v16  ;;  %v675_v44 = vpack.c.bf16 %v92_v43, %v91_v42  ;;  %v678_v47 = vpack.c.bf16 %v94_v46, %v93_v45  ;;  %v95_v48 = vld [vmem:[#allocation6 + $0xf8] sm:$0xff]  ;;  %v96_v49 = vld [vmem:[#allocation6 + $0x110] sm:$0xff]  ;;  %v97_v51 = vld [vmem:[#allocation6 + $0x128] sm:$0xff] }
  0x55   :  { %597 = vmatprep.mubr.msk.f32.mxu0 %vm829_vm0, %v830_v1  ;;  %667 = vmatpush3.bf16.msra.mxu0 %v666_v36  ;;  %v681_v50 = vpack.c.bf16 %v96_v49, %v95_v48  ;;  %v98_v52 = vld [vmem:[#allocation6 + $0x140] sm:$0xff]  ;;  %v99_v59 = vld [vmem:[#allocation6 + $0x158] sm:$0xff]  ;;  %v100_v60 = vld [vmem:[#allocation6 + $0x170] sm:$0xff] }
  0x56   :  { %649 = vmatpush3.bf16.msra.mxu1 %v648_v17  ;;  %668 = vmatprep.subr.bf16.mxu0 %v828_v0  ;;  %v684_v53 = vpack.c.bf16 %v98_v52, %v97_v51  ;;  %v457_v54 = vld [vmem:[#allocation7] ss:$0 sm:$0xff]  ;;  %v687_v61 = vpack.c.bf16 %v100_v60, %v99_v59  ;;  %v101_v62 = vld [vmem:[#allocation6 + $0x10] sm:$0xff]  ;;  %v102_v63 = vld [vmem:[#allocation6 + $0x28] sm:$0xff] }
  0x57   :  { %650 = vmatprep.subr.bf16.mxu1 %v828_v0  ;;  %v103_v2 = vld [vmem:[#allocation6 + $0x40] sm:$0xff]  ;;  %v690_v3 = vpack.c.bf16 %v102_v63, %v101_v62  ;;  %v104_v4 = vld [vmem:[#allocation6 + $0x58] sm:$0xff]  ;;  %v105_v6 = vld [vmem:[#allocation6 + $0x70] sm:$0xff] }
  0x58   :  { %v693_v5 = vpack.c.bf16 %v104_v4, %v103_v2  ;;  %v106_v7 = vld [vmem:[#allocation6 + $0x88] sm:$0xff]  ;;  %v108_v9 = vld [vmem:[#allocation6 + $0xb8] sm:$0xff]  ;;  %v109_v11 = vld [vmem:[#allocation6 + $0xd0] sm:$0xff] }
  0x59   :  { %670 = vmatpush3.bf16.msra.mxu0 %v669_v38  ;;  %v696_v8 = vpack.c.bf16 %v106_v7, %v105_v6  ;;  %v110_v12 = vld [vmem:[#allocation6 + $0xe8] sm:$0xff]  ;;  %v111_v14 = vld [vmem:[#allocation6 + $0x100] sm:$0xff]  ;;  %v112_v15 = vld [vmem:[#allocation6 + $0x118] sm:$0xff]  ;;  %v436_v38 = vlaneseq }
  0x5a   :  { %652 = vmatpush3.bf16.msra.mxu1 %v651_v20  ;;  %671 = vmatprep.subr.bf16.mxu0 %v828_v0  ;;  %v702_v13 = vpack.c.bf16 %v110_v12, %v109_v11  ;;  %v705_v16 = vpack.c.bf16 %v112_v15, %v111_v14  ;;  %v113_v17 = vld [vmem:[#allocation6 + $0x130] sm:$0xff]  ;;  %v114_v18 = vld [vmem:[#allocation6 + $0x148] sm:$0xff]  ;;  %v459_v20 = vld [vmem:[#allocation7 + $0x1] ss:$0 sm:$0xff] }
  0x5b   :  { %653 = vmatprep.subr.bf16.mxu1 %v828_v0  ;;  %v708_v19 = vpack.c.bf16 %v114_v18, %v113_v17  ;;  %v115_v25 = vld [vmem:[#allocation6 + $0x160] sm:$0xff]  ;;  %v437_v39 = vand.u32 127, %v436_v38 }
  0x5c   :  { %v460_v28 = vld [vmem:[#allocation7 + $0x2] ss:$0 sm:$0xff]  ;;  %v461_v33 = vld [vmem:[#allocation7 + $0x3] ss:$0 sm:$0xff] }
  0x5d   :  { %673 = vmatpush3.bf16.msra.mxu0 %v672_v41  ;;  %vm438_vm2 = vcmp.ge.s32.totalorder %v437_v39, 4  ;;  %vm439_vm3 = vcmp.lt.s32.totalorder %v437_v39, 8 }
  0x5e   :  { %655 = vmatpush3.bf16.msra.mxu1 %v654_v23  ;;  %674 = vmatprep.subr.bf16.mxu0 %v828_v0  ;;  %vm440_vm5 = vmand %vm438_vm2, %vm439_vm3 }
  0x5f   :  { %656 = vmatprep.subr.bf16.mxu1 %v828_v0 }
  0x61   :  { %676 = vmatpush3.bf16.msra.mxu0 %v675_v44 }
  0x62   :  { %658 = vmatpush3.bf16.msra.mxu1 %v657_v26  ;;  %677 = vmatprep.subr.bf16.mxu0 %v828_v0  ;;  %v116_v26 = vld [vmem:[#allocation6 + $0x178] sm:$0xff] }
  0x63   :  { %659 = vmatprep.subr.bf16.mxu1 %v828_v0  ;;  %v711_v27 = vpack.c.bf16 %v116_v26, %v115_v25 }
  0x65   :  { %679 = vmatpush3.bf16.msra.mxu0 %v678_v47 }
  0x66   :  { %661 = vmatpush3.bf16.msra.mxu1 %v660_v29  ;;  %680 = vmatprep.subr.bf16.mxu0 %v828_v0 }
  0x67   :  { %662 = vmatprep.subr.bf16.mxu1 %v828_v0 }
  0x69   :  { %682 = vmatpush3.bf16.msra.mxu0 %v681_v50 }
  0x6a   :  { %664 = vmatpush3.bf16.msra.mxu1 %v663_v32  ;;  %683 = vmatprep.subr.bf16.mxu0 %v828_v0 }
  0x6b   :  { %689 = vmatprep.subr.bf16.mxu1 %v828_v0 }
  0x6d   :  { %685 = vmatpush3.bf16.msra.mxu0 %v684_v53 }
  0x6e   :  { %686 = vmatprep.subr.bf16.mxu0 %v828_v0 }
  0x71   :  { %688 = vmatpush3.bf16.msra.mxu0 %v687_v61 }
 0x127   :  { %v201_v55 = vpop.f32.mrb[0].mxu0 }
 0x128   :  { %v202_v56 = vadd.f32 %v457_v54, %v201_v55  ;;  %v529_v57 = vpop.f32.mrb[1].mxu0 }
 0x12a   :  { %v205_v58 = vmax.f32 %v202_v56, 0.0 }
 0x12c   :  { %563 = vmatmul.mubr.f32.vlgmr.msra.gmra.mrb[0].mxu1 %v205_v58 }
 0x12d   :  { %632 = vmatprep.mubr.msk.f32.mxu1 %vm829_vm0, %v830_v1  ;;  %691 = vmatpush3.bf16.msra.mxu1 %v690_v3  ;;  %v107_v1 = vld [vmem:[#allocation6 + $0xa0] sm:$0xff] }
 0x12e   :  { %692 = vmatprep.subr.bf16.mxu1 %v828_v0  ;;  %v699_v10 = vpack.c.bf16 %v108_v9, %v107_v1 }
 0x131   :  { %694 = vmatpush3.bf16.msra.mxu1 %v693_v5 }
 0x132   :  { %695 = vmatprep.subr.bf16.mxu1 %v828_v0 }
 0x135   :  { %697 = vmatpush3.bf16.msra.mxu1 %v696_v8 }
 0x136   :  { %698 = vmatprep.subr.bf16.mxu1 %v828_v0 }
 0x139   :  { %700 = vmatpush3.bf16.msra.mxu1 %v699_v10 }
 0x13a   :  { %701 = vmatprep.subr.bf16.mxu1 %v828_v0 }
 0x13d   :  { %703 = vmatpush3.bf16.msra.mxu1 %v702_v13 }
 0x13e   :  { %704 = vmatprep.subr.bf16.mxu1 %v828_v0 }
 0x141   :  { %706 = vmatpush3.bf16.msra.mxu1 %v705_v16 }
 0x142   :  { %707 = vmatprep.subr.bf16.mxu1 %v828_v0 }
 0x145   :  { %709 = vmatpush3.bf16.msra.mxu1 %v708_v19 }
 0x146   :  { %710 = vmatprep.subr.bf16.mxu1 %v828_v0 }
 0x149   :  { %712 = vmatpush3.bf16.msra.mxu1 %v711_v27 }
 0x1ff   :  { %v278_v21 = vpop.f32.mrb[0].mxu1 }
 0x200   :  { %v279_v22 = vadd.f32 %v459_v20, %v278_v21  ;;  %v564_v23 = vpop.f32.mrb[1].mxu1 }
 0x202   :  { %v282_v24 = vmax.f32 %v279_v22, 0.0 }
 0x204   :  { %598 = vmatmul.mubr.f32.vlgmr.msra.gmra.mrb[2].mxu0 %v282_v24 }
 0x2d7   :  { %v355_v29 = vpop.f32.mrb[2].mxu0 }
 0x2d8   :  { %v356_v30 = vadd.f32 %v460_v28, %v355_v29  ;;  %v599_v31 = vpop.f32.mrb[3].mxu0 }
 0x2da   :  { %v359_v32 = vmax.f32 %v356_v30, 0.0 }
 0x2dc   :  { %633 = vmatmul.mubr.f32.vlgmr.msra.gmra.mrb[2].mxu1 %v359_v32 }
 0x3af   :  { %v432_v34 = vpop.f32.mrb[2].mxu1 }
 0x3b0   :  { %v433_v35 = vadd.f32 %v461_v33, %v432_v34  ;;  %v634_v0 = vpop.f32.mrb[3].mxu1 }
 0x3b2   :  { %v442_v36 = vmin.f32 %v433_v35, 0.0  ;;  %vm441_vm4 = vcmp.gt.f32.partialorder %v433_v35, 0.0 }
 0x3b4   :  { %v443_v37 = vmul.f32 1.442695, %v442_v36 }
 0x3b6   :  { %724 = vpow2.f32 %v443_v37 }
 0x3c0   :  { %v725_v40 = vpop.eup %724 }
 0x3c1   :  { %v462_v41 = vadd.f32 -1.0, %v725_v40 }
 0x3c3   :  { %v446_v42 = vsel %vm441_vm4, %v433_v35, %v462_v41 }
 0x3c4   :  { %v447_v43 = vadd.f32 1.0, %v446_v42 }
 0x3c6   :  { %v448_v44 = vsel %vm440_vm5, %v447_v43, %v433_v35 }
 0x3c7   :  { %449 = vst [vmem:[%s945_s4] sm:$0xff] %v448_v44 }
 0x3c8   :  { %454 = vsyncpa [#allocation3], 1 }
 0x3c9   :  { %455 = vsyncpa [#allocation5], 1 }
 0x3ca   :  { %456 = vsyncpa [#allocation8], 1 }

</bundles_post_ra>
